<compile_context>
chip_gen: v5e
topology: v5e:2x2
jax: 0.10.0
libtpu: 0.0.40
codegen_flags: <defaults>
</compile_context>

<pallas_src>
import math
from functools import partial

import jax
import jax.numpy as jnp
from jax import lax
from jax.experimental import pallas as pl
from jax.experimental.pallas import tpu as pltpu


# --------------------------------------------------------------------------
# Kernel
# --------------------------------------------------------------------------
def _attn_kernel(bias_ref, q_ref, k_ref, a_ref, out_ref):
    """One (bh_tile, q_tile) block of attention probabilities.

    q_ref    : (T, Tq, d_k)  VMEM bf16   (1/sqrt(d_k) already folded in)
    k_ref    : (T, S,  d_k)  VMEM bf16   (whole key axis; resident across q steps)
    a_ref    : (T, 1,  d_k)  VMEM bf16   (rank-1 aspect row per (b, h))
    bias_ref : (1,)          SMEM f32
    out_ref  : (T, Tq, S)    VMEM bf16
    """
    q = q_ref[...]                                   # bf16
    k = k_ref[...]                                   # bf16

    # scores = Q @ K^T : contract last dims directly (no K transpose
    # materialized), batched over the fused (b, h) axis, f32 accumulation.
    scores = lax.dot_general(
        q, k,
        dimension_numbers=(((2,), (2,)), ((0,), (0,))),
        preferred_element_type=jnp.float32)          # (T, Tq, S)

    # Aspect term is rank-1 along the query axis: one row per (b, h), computed
    # on the VPU (no M=1 MXU pass), then broadcast-added over the query dim.
    a32 = a_ref[...].astype(jnp.float32)             # (T, 1, d_k)
    k32 = k.astype(jnp.float32)                      # (T, S, d_k)
    asp_row = jnp.sum(a32 * k32, axis=-1)            # (T, S)
    scores = scores + jnp.tanh(asp_row + bias_ref[0])[:, None, :]

    # Softmax over the key axis (full key axis in-block -> no online softmax).
    m = jnp.max(scores, axis=-1, keepdims=True)
    e = jnp.exp(scores - m)
    denom = jnp.sum(e, axis=-1, keepdims=True)
    p = e * pl.reciprocal(denom, approx=True)        # divide -> EUP slot

    out_ref[...] = p.astype(out_ref.dtype)           # bf16 store


# --------------------------------------------------------------------------
# Tiling helpers
# --------------------------------------------------------------------------
def _vmem_capacity_bytes():
    """Generation-aware physical VMEM size; conservative (v7x) fallback."""
    try:
        info = pltpu.get_tpu_info()
        cap = getattr(info, "vmem_capacity_bytes", None)
        if cap:
            return int(cap)
    except Exception:
        pass
    return 64 << 20


def _pick_q_tile(S):
    # Tile the query axis only for long sequences; keep the whole key axis per
    # block so softmax needs no online rescaling.  Tiles are MXU-aligned
    # multiples of 128 -> lane-dense output stores on real workloads.
    if S % 128 != 0 or S <= 512:
        return S
    for qt in (512, 256, 128):
        if S % qt == 0:
            return qt
    return S


def _pick_bh_tile(n, step_bytes_fn, vmem_budget, min_steps=4):
    """Largest divisor of n that fits the VMEM budget while leaving >= min_steps
    grid steps, preferring an even step count (v7x 2-TensorCore split)."""
    divisors = [d for d in range(n, 0, -1) if n % d == 0]
    fitting = [d for d in divisors if step_bytes_fn(d) <= vmem_budget] or [1]
    want = min(min_steps, n)
    for d in fitting:                          # largest tile, even #steps
        if n // d >= want and (n // d) % 2 == 0:
            return d
    for d in fitting:                          # largest tile, enough steps
        if n // d >= want:
            return d
    return fitting[-1]                         # smallest fitting tile


# --------------------------------------------------------------------------
# Pallas wrapper
# --------------------------------------------------------------------------
def attention_pallas(q, k, asp, bias, *, out_dtype=jnp.bfloat16):
    """q, k: (N, S, d_k) bf16; asp: (N, 1, d_k) bf16; bias: (1,) f32.

    Returns (N, S, S) `out_dtype` attention probabilities.  N = B*h fused.
    """
    N, S, d_k = q.shape
    q_tile = _pick_q_tile(S)
    n_q = S // q_tile

    in_item = q.dtype.itemsize
    out_item = jnp.dtype(out_dtype).itemsize

    def step_bytes(t):
        # Double-buffered DMA blocks + in-kernel f32 intermediates.
        q_blk = t * q_tile * d_k * in_item
        k_blk = t * S * d_k * in_item
        a_blk = t * d_k * in_item
        o_blk = t * q_tile * S * out_item
        temps = 3 * t * q_tile * S * 4            # scores / exp / probs (f32)
        return 2 * (q_blk + k_blk + a_blk + o_blk) + temps

    capacity = _vmem_capacity_bytes()
    budget = int(capacity * 0.6)                  # working-set budget for tiling
    bh_tile = _pick_bh_tile(N, step_bytes, budget)
    n_bh = N // bh_tile

    vmem_limit = int(min(max(step_bytes(bh_tile) + (8 << 20), 32 << 20),
                         int(capacity * 0.85)))

    return pl.pallas_call(
        _attn_kernel,
        out_shape=jax.ShapeDtypeStruct((N, S, S), out_dtype),
        grid_spec=pltpu.PrefetchScalarGridSpec(
            num_scalar_prefetch=0,
            grid=(n_bh, n_q),
            in_specs=[
                pl.BlockSpec(memory_space=pltpu.MemorySpace.SMEM),              # bias
                pl.BlockSpec((bh_tile, q_tile, d_k), lambda i, qi: (i, qi, 0)),  # q
                pl.BlockSpec((bh_tile, S, d_k), lambda i, qi: (i, 0, 0)),        # k (resident over qi)
                pl.BlockSpec((bh_tile, 1, d_k), lambda i, qi: (i, 0, 0)),        # asp row
            ],
            out_specs=pl.BlockSpec((bh_tile, q_tile, S), lambda i, qi: (i, qi, 0)),
        ),
        compiler_params=pltpu.CompilerParams(
            dimension_semantics=("parallel", "arbitrary"),
            vmem_limit_bytes=vmem_limit),
    )(bias, q, k, asp)


# --------------------------------------------------------------------------
# Module glue (projections) + reference
# --------------------------------------------------------------------------
def init_params(key, h, d_model):
    """Deterministic synthetic parameters (shapes from the module __init__)."""
    d_k = d_model // h
    ks = jax.random.split(key, 7)
    s = 1.0 / math.sqrt(d_model)
    return {
        # nn.Linear(d_model, d_model) x2 — stored as (in, out) so y = x @ W + b
        "lin_q_w": jax.random.normal(ks[0], (d_model, d_model), jnp.float32) * s,
        "lin_q_b": jax.random.normal(ks[1], (d_model,), jnp.float32) * s,
        "lin_k_w": jax.random.normal(ks[2], (d_model, d_model), jnp.float32) * s,
        "lin_k_b": jax.random.normal(ks[3], (d_model,), jnp.float32) * s,
        # nn.Linear(d_model, d_k)
        "dense_w": jax.random.normal(ks[4], (d_model, d_k), jnp.float32) * s,
        "dense_b": jax.random.normal(ks[5], (d_k,), jnp.float32) * s,
        # nn.Parameter(torch.Tensor(1))
        "bias": jax.random.normal(ks[6], (1,), jnp.float32),
    }


@partial(jax.jit, static_argnames=("h",))
def multi_head_attention_forward(params, query, key, aspect, h):
    """query, key: (B, S, d_model); aspect: (B, d_model) -> attn (B, h, S, S) bf16."""
    B, S, d_model = query.shape
    d_k = d_model // h
    scale = 1.0 / math.sqrt(d_k)

    # Fold 1/sqrt(d_k) into the Q projection (exact, done once) so the kernel
    # never multiplies the full S^2 score tensor by a scalar.
    qw = params["lin_q_w"] * scale
    qb = params["lin_q_b"] * scale

    # Linear projections (f32 for accuracy); split heads, fuse (B, h) -> N.
    # Under jit the bf16 casts fuse into the transpose copy (no extra HBM pass).
    q = (query @ qw + qb).reshape(B, S, h, d_k)
    q = jnp.transpose(q, (0, 2, 1, 3)).reshape(B * h, S, d_k).astype(jnp.bfloat16)
    k = (key @ params["lin_k_w"] + params["lin_k_b"]).reshape(B, S, h, d_k)
    k = jnp.transpose(k, (0, 2, 1, 3)).reshape(B * h, S, d_k).astype(jnp.bfloat16)

    # Aspect dense projection is head-independent (the PyTorch code expands
    # the same row to every head and query position): one (1, d_k) row per
    # (b, h), rank-1 along the query axis — no (B, h, S, d_k) materialization.
    asp = aspect @ params["dense_w"] + params["dense_b"]               # (B, d_k)
    asp = jnp.broadcast_to(asp[:, None, :], (B, h, d_k))
    asp = asp.reshape(B * h, 1, d_k).astype(jnp.bfloat16)

    attn = attention_pallas(q, k, asp, params["bias"])                 # (N, S, S) bf16
    return attn.reshape(B, h, S, S)


def _reference(params, query, key, aspect, h):
    """Pure-JAX f32 reference with the full (non-rank-1) aspect matmul."""
    B, S, d_model = query.shape
    d_k = d_model // h
    q = (query @ params["lin_q_w"] + params["lin_q_b"]).reshape(B, S, h, d_k)
    q = jnp.transpose(q, (0, 2, 1, 3))
    k = (key @ params["lin_k_w"] + params["lin_k_b"]).reshape(B, S, h, d_k)
    k = jnp.transpose(k, (0, 2, 1, 3))
    asp = jnp.broadcast_to(aspect[:, None, :], (B, h, d_model))
    asp = asp @ params["dense_w"] + params["dense_b"]
    asp = jnp.broadcast_to(asp[:, :, None, :], (B, h, S, d_k))
    scores = jnp.einsum("bhqd,bhkd->bhqk", q, k) / math.sqrt(d_k)
    aspect_scores = jnp.tanh(jnp.einsum("bhqd,bhkd->bhqk", asp, k) + params["bias"][0])
    return jax.nn.softmax(scores + aspect_scores, axis=-1)


if __name__ == "__main__":
    # Small shapes consistent with the module: h=4, d_model=32 (d_k=8), B=2, S=8.
    B, S, h, d_model = 2, 8, 4, 32

    root = jax.random.PRNGKey(0)
    k_param, k_q, k_k, k_a = jax.random.split(root, 4)

    params = init_params(k_param, h, d_model)
    query = jax.random.normal(k_q, (B, S, d_model), jnp.float32)
    key = jax.random.normal(k_k, (B, S, d_model), jnp.float32)
    aspect = jax.random.normal(k_a, (B, d_model), jnp.float32)

    attn = multi_head_attention_forward(params, query, key, aspect, h)
    attn = jax.block_until_ready(attn)

    ref = _reference(params, query, key, aspect, h)
    assert attn.shape == (B, h, S, S)
    # bf16 matmul operands / bf16 output + approx reciprocal -> loosened tolerance.
    assert jnp.allclose(attn.astype(jnp.float32), ref, atol=2e-2, rtol=2e-2), \
        "mismatch vs JAX reference"

    print("KERNEL_OK")
</pallas_src>

<mosaic_0001>
module attributes {stable_mosaic.version = 11 : i64} {
  func.func @_attn_kernel(%arg0: i32, %arg1: i32, %arg2: memref<1xf32, #tpu.memory_space<smem>>, %arg3: memref<2x8x8xbf16, #tpu.memory_space<vmem>>, %arg4: memref<2x8x8xbf16, #tpu.memory_space<vmem>>, %arg5: memref<2x1x8xbf16, #tpu.memory_space<vmem>>, %arg6: memref<2x8x8xbf16, #tpu.memory_space<vmem>>) attributes {dimension_semantics = [#tpu.dimension_semantics<parallel>, #tpu.dimension_semantics<arbitrary>], iteration_bounds = array<i64: 4, 1>, scalar_prefetch = 0 : i64, scratch_operands = 0 : i64, tpu.core_type = #tpu.core_type<tc>, window_params = [{transform_indices = @transform_0, window_bounds = array<i64: 1>}, {transform_indices = @transform_1, window_bounds = array<i64: 2, 8, 8>}, {transform_indices = @transform_2, window_bounds = array<i64: 2, 8, 8>}, {transform_indices = @transform_3, window_bounds = array<i64: 2, 1, 8>}, {transform_indices = @transform_4, window_bounds = array<i64: 2, 8, 8>}]} {
    %c0 = arith.constant 0 : index
    %c0_0 = arith.constant 0 : index
    %c0_1 = arith.constant 0 : index
    %0 = vector.load %arg3[%c0, %c0_0, %c0_1] : memref<2x8x8xbf16, #tpu.memory_space<vmem>>, vector<2x8x8xbf16>
    %c0_2 = arith.constant 0 : index
    %c0_3 = arith.constant 0 : index
    %c0_4 = arith.constant 0 : index
    %1 = vector.load %arg4[%c0_2, %c0_3, %c0_4] : memref<2x8x8xbf16, #tpu.memory_space<vmem>>, vector<2x8x8xbf16>
    %cst = arith.constant dense<0.000000e+00> : vector<2x8x8xf32>
    %2 = tpu.matmul %0, %1, %cst {dimension_numbers = #tpu.dot_dimension_numbers<[2], [2], [1], [1], [0, 0, 0, 1, 1, 1], [0], [0]>} : vector<2x8x8xbf16>, vector<2x8x8xbf16>, vector<2x8x8xf32> -> vector<2x8x8xf32>
    %c0_5 = arith.constant 0 : index
    %c0_6 = arith.constant 0 : index
    %c0_7 = arith.constant 0 : index
    %3 = vector.load %arg5[%c0_5, %c0_6, %c0_7] : memref<2x1x8xbf16, #tpu.memory_space<vmem>>, vector<2x1x8xbf16>
    %4 = arith.extf %3 : vector<2x1x8xbf16> to vector<2x1x8xf32>
    %5 = arith.extf %1 : vector<2x8x8xbf16> to vector<2x8x8xf32>
    %6 = vector.broadcast %4 : vector<2x1x8xf32> to vector<2x8x8xf32>
    %7 = arith.mulf %6, %5 : vector<2x8x8xf32>
    %cst_8 = arith.constant dense<0.000000e+00> : vector<2x8xf32>
    %8 = vector.multi_reduction <add>, %7, %cst_8 [2] : vector<2x8x8xf32> to vector<2x8xf32>
    %c0_9 = arith.constant 0 : index
    %9 = memref.load %arg2[%c0_9] : memref<1xf32, #tpu.memory_space<smem>>
    %10 = vector.broadcast %9 : f32 to vector<2x8xf32>
    %11 = arith.addf %8, %10 : vector<2x8xf32>
    %12 = math.tanh %11 : vector<2x8xf32>
    %13 = vector.shape_cast %12 : vector<2x8xf32> to vector<2x1x8xf32>
    %14 = vector.broadcast %13 : vector<2x1x8xf32> to vector<2x8x8xf32>
    %15 = arith.addf %2, %14 : vector<2x8x8xf32>
    %cst_10 = arith.constant dense<0xFF800000> : vector<2x8xf32>
    %16 = vector.multi_reduction <maximumf>, %15, %cst_10 [2] : vector<2x8x8xf32> to vector<2x8xf32>
    %17 = vector.shape_cast %16 : vector<2x8xf32> to vector<2x8x1xf32>
    %18 = vector.broadcast %17 : vector<2x8x1xf32> to vector<2x8x8xf32>
    %19 = arith.subf %15, %18 : vector<2x8x8xf32>
    %20 = math.exp %19 : vector<2x8x8xf32>
    %cst_11 = arith.constant dense<0.000000e+00> : vector<2x8xf32>
    %21 = vector.multi_reduction <add>, %20, %cst_11 [2] : vector<2x8x8xf32> to vector<2x8xf32>
    %22 = vector.shape_cast %21 : vector<2x8xf32> to vector<2x8x1xf32>
    %23 = tpu.reciprocal %22 {approx = true} : vector<2x8x1xf32> -> vector<2x8x1xf32>
    %24 = vector.broadcast %23 : vector<2x8x1xf32> to vector<2x8x8xf32>
    %25 = arith.mulf %20, %24 : vector<2x8x8xf32>
    %26 = arith.truncf %25 : vector<2x8x8xf32> to vector<2x8x8xbf16>
    %c0_12 = arith.constant 0 : index
    %c0_13 = arith.constant 0 : index
    %c0_14 = arith.constant 0 : index
    %27 = vector.load %arg6[%c0_12, %c0_13, %c0_14] : memref<2x8x8xbf16, #tpu.memory_space<vmem>>, vector<2x8x8xbf16>
    tpu.vector_store %arg6[%c0_12, %c0_13, %c0_14], %26 {strides = array<i32>} : memref<2x8x8xbf16, #tpu.memory_space<vmem>>, vector<2x8x8xbf16>,
    return
  }
  func.func @transform_0(%arg0: i32, %arg1: i32) -> i32 {
    %c0_i32 = arith.constant 0 : i32
    %c0_i32_0 = arith.constant 0 : i32
    return %c0_i32 : i32
  }
  func.func @transform_1(%arg0: i32, %arg1: i32) -> (i32, i32, i32) {
    %c0_i32 = arith.constant 0 : i32
    %c0_i32_0 = arith.constant 0 : i32
    return %arg0, %arg1, %c0_i32 : i32, i32, i32
  }
  func.func @transform_2(%arg0: i32, %arg1: i32) -> (i32, i32, i32) {
    %c0_i32 = arith.constant 0 : i32
    %c0_i32_0 = arith.constant 0 : i32
    %c0_i32_1 = arith.constant 0 : i32
    return %arg0, %c0_i32, %c0_i32_0 : i32, i32, i32
  }
  func.func @transform_3(%arg0: i32, %arg1: i32) -> (i32, i32, i32) {
    %c0_i32 = arith.constant 0 : i32
    %c0_i32_0 = arith.constant 0 : i32
    %c0_i32_1 = arith.constant 0 : i32
    return %arg0, %c0_i32, %c0_i32_0 : i32, i32, i32
  }
  func.func @transform_4(%arg0: i32, %arg1: i32) -> (i32, i32, i32) {
    %c0_i32 = arith.constant 0 : i32
    %c0_i32_0 = arith.constant 0 : i32
    return %arg0, %arg1, %c0_i32 : i32, i32, i32
  }
}

</mosaic_0001>

<bundles_post_ra>
// kernel: multi_head_attention_forward.1
= control target key start
LH: loop header
LB: loop body
LE: loop exit
PB: predicated region body
PF: predicated region fallthrough
CT: control target
= control target key end

     0   :  { %s808_s0 = inlined_call_operand.<no memory space> [shape: f32[1], index: 0, kind: input, shape index: {}]   ;;  %s809_s1 = inlined_call_operand.vmem [shape: bf16[8,8,8], index: 1, kind: input, shape index: {}]   ;;  %s810_s2 = inlined_call_operand.vmem [shape: bf16[8,8,8], index: 2, kind: input, shape index: {}]   ;;  %s811_s3 = inlined_call_operand.vmem [shape: bf16[8,1,8], index: 3, kind: input, shape index: {}]   ;;  %s812_s4 = inlined_call_operand.hbm [shape: bf16[8,8,8], index: 4, kind: output, shape index: {}]  }
   0x1   :  { %9 = sst [smem:[#allocation2]] %s808_s0 }
   0x2   :  { %10 = vsyncpa [#allocation4], 0 }
   0x3   :  { %12 = vsyncpa [#allocation4 + $0x1], 0  ;;  %s696_s17 = smov 0   ;;  %s698_s18 = smov 0  }
   0x4   :  { %s700_s19 = smov 0   ;;  %s702_s20 = smov 0  }
   0x5   :  { %s704_s21 = smov 0   ;;  %s706_s22 = smov 0  }
   0x6 LB: > { %s498_s0 = sadd.s32 4294967295, %s664_s22   ;;  %s499_s23 = sadd.s32 4294967294, %s664_s22   ;;  %s664_s22 = sphi %s706_s22, %s18_s22   ;;  %s660_s21 = sphi %s704_s21, %s819_s21   ;;  %s656_s20 = sphi %s702_s20, %s818_s20   ;;  %s652_s19 = sphi %s700_s19, %s817_s19   ;;  %s648_s18 = sphi %s698_s18, %s816_s18   ;;  %s644_s17 = sphi %s696_s17, %s815_s17  }
   0x7   : > { %s30_s24 = sadd.s32 1, %s660_s21  ;;  %s140_s25 = sadd.s32 1, %s652_s19 }
   0x8   : > { %p32_p0 = scmp.ge.s32.totalorder %s30_s24, 4  ;;  %p150_p1 = scmp.ne.s32.totalorder %s652_s19, %s648_s18 }
   0x9   : > { %p151_p2 = scmp.eq.s32.totalorder %s498_s0, 3  ;;  %p156_p3 = scmp.ne.s32.totalorder %s648_s18, %s644_s17 }
   0xa   : > { %s821_s24 = smov (%p32_p0, %s30_s24), 0  ;;  %p157_p5 = scmp.eq.s32.totalorder %s499_s23, 3 }
   0xb   : > { %p736_p4 = por %p151_p2, %p150_p1  ;;  %s135_s27 = ssub.s32 %s660_s21, %s821_s24 }
   0xc   : > { %p502_p6 = scmp.ge.s32.totalorder %s664_s22, 1  ;;  %p138_p7 = scmp.eq.s32.totalorder %s135_s27, 0 }
   0xd   : > { %p743_p8 = por %p157_p5, %p156_p3  ;;  %p207_p9 = scmp.lt.s32.totalorder %s664_s22, 5 }
   0xe   : > { %s749_s29 = scalar_select %p138_p7, %s652_s19, %s140_s25  }
   0xf   : > { %p208_p10 = pnand %p502_p6, %p207_p9 }
  0x10   : > { %s504_s30 = sshll.u32 (!%p208_p10), %s656_s20, 1  ;;  %s288_s15 = sld [smem:[#allocation2]] (!%p208_p10) }
  0x11   : > { %211 = sbr.rel (%p208_p10) target bundleno = 430 (0x1ae), region = 36  ;;  %p246_p11 = scmp.lt.s32.totalorder (!%p208_p10), %s504_s30, 7 }
  0x12   : > { %s242_s16 = sand.u32 (!%p208_p10), 1, %s648_s18   ;;  %s516_s23 = sshll.u32 (!%p208_p10), %s656_s20, 3 }
  0x13   : > { %s503_s0 = sshll.u32 (!%p208_p10), %s242_s16, 3  ;;  %s606_s12 = scalar_lea.hbm (!%p208_p10), %s812_s4, 32 }
  0x16   : > { %s823_s30 = smov (!%p246_p11, %s504_s30), 7  ;;  %vm281_vm0 = vcmask 64512   ;;  %v289_v18 = vstv %s288_s15  ;;  %v295_v21 = vlaneseq  ;;  %vm382_vm1 = vcmask 60416  }
  0x17   : > { %s505_s5 = sshll.u32 %s823_s30, 2  ;;  %s263_s8 = scalar_lea.vmem %s811_s3, %s823_s30 }
  0x18   : > { %s258_s11 = scalar_lea.vmem %s810_s2, %s505_s5  ;;  %v271_v0 = vld [vmem:[%s263_s8] sm:$0x1]  ;;  %v272_v1 = vld [vmem:[%s263_s8 + $0x1] sm:$0x1]  ;;  %s252_s14 = scalar_lea.vmem %s809_s1, %s505_s5  ;;  %v296_v22 = vand.u32 127, %v295_v21 }
  0x19   : > { %v269_v2 = vld [vmem:[%s258_s11] sm:$0xf]  ;;  %v270_v3 = vld [vmem:[%s258_s11 + $0x4] sm:$0xf]  ;;  %v273_v4 = vunpack.c.l.bf16 %v271_v0  ;;  %v274_v5 = vunpack.c.l.bf16 %v272_v1  ;;  %s398_s30 = scalar_lea.hbm %s812_s4, %s516_s23  ;;  %s244_s5 = scalar_lea.vmem [#allocation3], %s503_s0 }
  0x1a   : > { %v275_v6 = vunpack.c.l.bf16 %v269_v2  ;;  %v315_v7 = vsel %vm281_vm0, %v269_v2, 0  ;;  %v343_v8 = vsel %vm281_vm0, %v270_v3, 0  ;;  %v276_v10 = vunpack.c.l.bf16 %v270_v3  ;;  %v267_v14 = vld [vmem:[%s252_s14] sm:$0xf]  ;;  %v268_v15 = vld [vmem:[%s252_s14 + $0x4] sm:$0xf] }
  0x1b   : > { %324 = vmatpush.bf16.xpose.msra.mxu0 %v315_v7  ;;  %352 = vmatpush.bf16.xpose.msra.mxu1 %v343_v8  ;;  %v277_v9 = vperm.slane %v273_v4, 0  ;;  %v278_v12 = vperm.slane %v274_v5, 0  ;;  %s399_s6 = sshll.u32 %s244_s5, 4  ;;  %s401_s7 = sshll.u32 %s398_s30, 4  ;;  %s400_s6 = int_to_ptr.vmem [resolvable:$true] %s399_s6  ;;  %s402_s7 = int_to_ptr.hbm [resolvable:$true] %s401_s7 }
  0x1c   : > { %s386_s8 = scalar_lea.sflag [#allocation4], %s242_s16  ;;  %s600_s20 = sshra.s32 %s402_s7, 4  ;;  %s601_s20 = int_to_ptr.hbm [resolvable:$true] %s600_s20 }
  0x1d   : > { %v279_v11 = vmul.f32 %v277_v9, %v275_v6  ;;  %v280_v16 = vmul.f32 %v278_v12, %v276_v10  ;;  %s602_s9 = scalar_lea.hbm %s601_s20, 8  ;;  %p607_p1 = scmp.lt.s32.totalorder %s601_s20, %s812_s4 }
  0x1e   : > { %p603_p12 = scmp.ne.s32.totalorder %s601_s20, %s602_s9  ;;  %p608_p2 = scmp.lt.s32.totalorder %s606_s12, %s602_s9 }
  0x1f   : > { %v282_v13 = vsel %vm281_vm0, %v279_v11, 0.0  ;;  %v285_v17 = vsel %vm281_vm0, %v280_v16, 0.0 }
  0x20   : > { %283 = vadd.xlane.f32.xlu0 %v282_v13  ;;  %p604_p13 = pnand %p603_p12, %p736_p4  ;;  %p609_p3 = por %p608_p2, %p607_p1 }
  0x22   : > { %509 = vmatmul.msk.bf16.vlgmr.msra.gmra.mxu0 %vm281_vm0, %v267_v14  ;;  %510 = vmatmul.msk.bf16.vlgmr.msra.gmra.mxu1 %vm281_vm0, %v268_v15  ;;  %p605_p0 = pneg %p604_p13 }
  0x24   : > { %p610_p5 = pnand %p609_p3, %p605_p0 }
  0x28   : > { %286 = vadd.xlane.f32.xlu0 %v285_v17 }
  0x93   : > { %v284_v19 = vpop.xlane.xlu0 %283 }
  0x94   : > { %v290_v20 = vadd.f32 %v289_v18, %v284_v19 }
  0x96   : > { %574 = vtanh.f32 %v290_v20 }
  0x9b   : > { %v287_v23 = vpop.xlane.xlu0 %286 }
  0x9c   : > { %v575_v24 = vpop.eup %574  ;;  %v291_v25 = vadd.f32 %v289_v18, %v287_v23 }
  0x9d   : > { %v297_v26 = vperm.slane %v575_v24, %v296_v22 }
  0x9e   : > { %576 = vtanh.f32 %v291_v25 }
  0x9f   : > { %v326_v27 = vpop.f32.mrf.mxu0  ;;  %v354_v28 = vpop.f32.mrf.mxu1 }
  0xa0   : > { %v327_v29 = vadd.f32 %v326_v27, %v297_v26 }
  0xa2   : > { %v358_v30 = vsel %vm281_vm0, %v327_v29, -inf }
  0xa3   : > { %359 = vmax.xlane.f32.xlu1 %v358_v30 }
  0xa4   : > { %v577_v31 = vpop.eup %576 }
  0xa5   : > { %v331_v32 = vperm.slane %v577_v31, %v296_v22 }
  0xa7   : > { %v355_v33 = vadd.f32 %v354_v28, %v331_v32  ;;  %v328_v34 = vpop.f32.mrf.mxu0  ;;  %v356_v35 = vpop.f32.mrf.mxu1 }
  0xa9   : > { %v361_v36 = vsel %vm281_vm0, %v355_v33, -inf }
  0xab   : > { %362 = vmax.xlane.f32.xlu1 %v361_v36 }
 0x116   : > { %v360_v37 = vpop.xlane.xlu1 %359 }
 0x117   : > { %v364_v38 = vsub.f32 %v327_v29, %v360_v37 }
 0x119   : > { %v366_v39 = vmul.f32 1.442695, %v364_v38 }
 0x11b   : > { %578 = vpow2.f32 %v366_v39 }
 0x11e   : > { %v363_v40 = vpop.xlane.xlu1 %362 }
 0x11f   : > { %v365_v41 = vsub.f32 %v355_v33, %v363_v40 }
 0x121   : > { %v579_v42 = vpop.eup %578  ;;  %v368_v43 = vmul.f32 1.442695, %v365_v41 }
 0x122   : > { %v370_v44 = vsel %vm281_vm0, %v579_v42, 0.0 }
 0x123   : > { %580 = vpow2.f32 %v368_v43  ;;  %371 = vadd.xlane.f32.xlu2 %v370_v44 }
 0x129   : > { %v581_v45 = vpop.eup %580 }
 0x12a   : > { %v373_v46 = vsel %vm281_vm0, %v581_v45, 0.0 }
 0x12b   : > { %374 = vadd.xlane.f32.xlu2 %v373_v46 }
 0x196   : > { %v372_v47 = vpop.xlane.xlu2 %371 }
 0x197   : > { %582 = vrcp.f32 %v372_v47 }
 0x19d   : > { %v583_v48 = vpop.eup %582 }
 0x19e   : > { %v378_v49 = vmul.f32 %v583_v48, %v579_v42  ;;  %v375_v50 = vpop.xlane.xlu2 %374 }
 0x19f   : > { %584 = vrcp.f32 %v375_v50 }
 0x1a0   : > { %v380_v51 = vpack.c.bf16 %v378_v49, %v378_v49 }
 0x1a2   : > { %383 = vst.msk [vmem:[%s244_s5] sm:$0xf] %vm382_vm1, %v380_v51 }
 0x1a5   : > { %v585_v52 = vpop.eup %584 }
 0x1a6   : > { %v379_v53 = vmul.f32 %v585_v52, %v581_v45 }
 0x1a8   : > { %v381_v54 = vpack.c.bf16 %v379_v53, %v379_v53 }
 0x1aa   : > { %384 = vst.msk [vmem:[%s244_s5 + $0x4] sm:$0xf] %vm382_vm1, %v381_v54 }
 0x1ab   : > { %613 = shalt.err (!%p610_p5)
}
 0x1ac   : > { %s666_s15 = smov 64   ;;  %s667_s16 = smov 4  }
 0x1ad   : > { %517 = dma.vmem_to_hbm [thread:$0]  (%p736_p4), %s400_s6, 128, %s402_s7, %s386_s8, %s666_s15, %s666_s15, %s667_s16  }
 0x1ae PF: > { %p523_p6 = scmp.ge.s32.totalorder %s664_s22, 2  ;;  %s416_s0 = sand.u32 1, %s644_s17  }
 0x1af   : > { %s417_s23 = scalar_lea.sflag [#allocation4], %s416_s0 }
 0x1b0   : > { %p520_p7 = pnand %p523_p6, %p743_p8 }
 0x1b2   : > { %p521_p9 = pneg %p520_p7 }
 0x1b4   : > { %639 = dma.done.wait (%p521_p9), %s417_s23, 128  }
 0x1b5   : > { %641 = vsyncadd (%p521_p9), %s417_s23, 4294967168  ;;  %s18_s22 = sadd.s32 1, %s664_s22   ;;  %s815_s17 = smov %s648_s18 }
 0x1b6   : > { %p15_p10 = scmp.ge.s32.totalorder %s18_s22, 6   ;;  %s816_s18 = smov %s652_s19 }
 0x1b7   : > { %s817_s19 = smov %s749_s29  ;;  %s818_s20 = smov %s660_s21 }
 0x1b8   : > { %s819_s21 = smov %s821_s24  ;;  %17 = sbr.rel (!%p15_p10) target bundleno = 6 (0x6), region = 77 }
 0x1bd   :  { %423 = vsyncpa [#allocation4], 1 }
 0x1be   :  { %425 = vsyncpa [#allocation4 + $0x1], 1 }

</bundles_post_ra>
